<compile_context>
chip_gen: v7x
topology: tpu7x:2x2x1
jax: 0.10.0
libtpu: 0.0.40
codegen_flags: <defaults>
</compile_context>

<pallas_src>
import functools

import jax
import jax.numpy as jnp
from jax import lax
from jax.experimental import pallas as pl
from jax.experimental.pallas import tpu as pltpu


def _round_up(x, m):
    return (x + m - 1) // m * m


# ---------------------------------------------------------------------------
# Kernels
# ---------------------------------------------------------------------------

def _repconv_rows_kernel(x_ref, w_ref, b_ref, o_ref, *, k, wo):
    """Row-tile conv kernel (stride 1).

    x_ref: (tile_h, Wp, k*C1)  -- k row-taps pre-gathered along channels
    w_ref: (k, k*C1, C2p)      -- fused weights, one (k*C1, C2p) slab per kw
    b_ref: (1, C2p)            -- fused bias (f32)
    o_ref: (tile_h*Wo, C2p)    -- f32 output rows (lane-dense)
    """
    tile_h = x_ref.shape[0]
    kc1 = x_ref.shape[2]
    c2p = o_ref.shape[1]
    xv = x_ref[...]
    acc = jnp.zeros((tile_h * wo, c2p), jnp.float32)
    for kw in range(k):                                   # static, small
        xs = xv[:, kw:kw + wo, :].reshape(tile_h * wo, kc1)
        acc = acc + jnp.dot(xs, w_ref[kw], preferred_element_type=jnp.float32)
    o_ref[...] = acc + b_ref[...]


def _repconv_gemm_kernel(patches_ref, w_ref, b_ref, o_ref):
    """Full-im2col GEMM kernel (any stride).

    patches_ref: (TILE_HW, k*k*C1); w_ref: (k*k*C1, C2p); b_ref: (1, C2p);
    o_ref: (TILE_HW, C2p).
    """
    acc = jnp.dot(patches_ref[...], w_ref[...], preferred_element_type=jnp.float32)
    o_ref[...] = acc + b_ref[...]


# ---------------------------------------------------------------------------
# Parameter folding (conv+BN, conv1x+BN1x, alpha  ->  one weight/bias)
# ---------------------------------------------------------------------------

def _fold_params(params, k):
    eps = params["eps"]

    def bn_fold(g, b, m, v):
        scale = g / jnp.sqrt(v + eps)
        return scale, b - m * scale

    scale1, bias1 = bn_fold(params["g1"], params["b1"], params["m1"], params["v1"])
    scale2, bias2 = bn_fold(params["g2"], params["b2"], params["m2"], params["v2"])
    a = params["alpha"].reshape(()).astype(jnp.float32)

    # (C2, C1, kh, kw) -> (kh, kw, C1, C2), scaled by alpha * BN1 scale
    w_full = jnp.transpose(params["wk"], (2, 3, 1, 0)) * (a * scale1)
    w1_cio = jnp.transpose(params["w1"][:, :, 0, 0], (1, 0))        # (C1, C2)
    c = k // 2
    w_full = w_full.at[c, c].add(w1_cio * ((1.0 - a) * scale2))      # center tap
    b_fused = (a * bias1 + (1.0 - a) * bias2).reshape(1, -1)
    return w_full, b_fused


# ---------------------------------------------------------------------------
# Forward paths
# ---------------------------------------------------------------------------

def _forward_rows(xp, w_full, b_pad, *, k, Ho, Wo, Wp, C1, C2, C2p,
                  compute_dtype, in_bytes, tile_cap, vmem_limit_bytes):
    """Stride-1 path: only the k row-taps are gathered in glue (k x HBM)."""
    N = xp.shape[0]
    kc1 = k * C1

    rows = [xp[:, kh:kh + Ho, :, :] for kh in range(k)]
    patches = jnp.concatenate(rows, axis=-1)              # (N, Ho, Wp, k*C1)

    # one (k*C1, C2p) weight slab per kw tap; contraction order (kh, c1)
    # matches the channel-concat order above.
    w_taps = jnp.transpose(w_full, (1, 0, 2, 3)).reshape(k, kc1, C2)
    w_taps = jnp.pad(w_taps, ((0, 0), (0, 0), (0, C2p - C2)))

    patches = patches.astype(compute_dtype)
    w_taps = w_taps.astype(compute_dtype)

    # row-tile sizing against a conservative scoped-VMEM budget
    row_bytes = Wp * kc1 * in_bytes + Wo * C2p * 4
    resident = k * kc1 * C2p * in_bytes + 4 * C2p
    budget = 20 * 1024 * 1024 - 2 * resident
    tile_h = max(8, budget // (3 * row_bytes))
    tile_h = min(tile_h, tile_cap, _round_up(Ho, 8))
    tile_h = max(8, (tile_h // 8) * 8)                    # mult of 8 -> dense vst
    Ho_pad = _round_up(Ho, tile_h)
    if Ho_pad != Ho:
        patches = jnp.pad(patches, ((0, 0), (0, Ho_pad - Ho), (0, 0), (0, 0)))
    n_tiles = Ho_pad // tile_h

    kernel = functools.partial(_repconv_rows_kernel, k=k, wo=Wo)
    out = pl.pallas_call(
        kernel,
        out_shape=jax.ShapeDtypeStruct((N, Ho_pad * Wo, C2p), jnp.float32),
        grid_spec=pltpu.PrefetchScalarGridSpec(
            num_scalar_prefetch=0,
            grid=(N, n_tiles),
            in_specs=[
                pl.BlockSpec((None, tile_h, Wp, kc1), lambda n, r: (n, r, 0, 0)),
                pl.BlockSpec((k, kc1, C2p), lambda n, r: (0, 0, 0)),
                pl.BlockSpec((1, C2p), lambda n, r: (0, 0)),
            ],
            out_specs=pl.BlockSpec((None, tile_h * Wo, C2p),
                                   lambda n, r: (n, r, 0)),
        ),
        compiler_params=pltpu.CompilerParams(
            dimension_semantics=("parallel", "parallel"),
            vmem_limit_bytes=vmem_limit_bytes),
    )(patches, w_taps, b_pad)

    out = out[:, :Ho * Wo, :C2].reshape(N, Ho, Wo, C2)
    return jnp.transpose(out, (0, 3, 1, 2))


def _forward_im2col(xp, w_full, b_pad, *, k, s, Ho, Wo, C1, C2, C2p,
                    compute_dtype, in_bytes, vmem_limit_bytes):
    """General-stride fallback: full im2col + single GEMM kernel."""
    N = xp.shape[0]
    HW = Ho * Wo
    KC = k * k * C1

    cols = []
    for kh in range(k):
        for kw in range(k):
            cols.append(xp[:, kh:kh + s * Ho:s, kw:kw + s * Wo:s, :])
    patches = jnp.concatenate(cols, axis=-1).reshape(N, HW, KC)

    w_mat = jnp.pad(w_full.reshape(KC, C2), ((0, 0), (0, C2p - C2)))

    patches = patches.astype(compute_dtype)
    w_mat = w_mat.astype(compute_dtype)

    bytes_per_row = in_bytes * KC + 4 * C2p
    resident = in_bytes * KC * C2p + 4 * C2p
    budget = 20 * 1024 * 1024 - 2 * resident
    tile_hw = max(8, budget // (2 * bytes_per_row))
    tile_hw = min(tile_hw, 512, _round_up(HW, 8))
    tile_hw = max(8, (tile_hw // 8) * 8)
    HW_pad = _round_up(HW, tile_hw)
    if HW_pad != HW:
        patches = jnp.pad(patches, ((0, 0), (0, HW_pad - HW), (0, 0)))
    n_tiles = HW_pad // tile_hw

    out = pl.pallas_call(
        _repconv_gemm_kernel,
        out_shape=jax.ShapeDtypeStruct((N, HW_pad, C2p), jnp.float32),
        grid_spec=pltpu.PrefetchScalarGridSpec(
            num_scalar_prefetch=0,
            grid=(N, n_tiles),
            in_specs=[
                pl.BlockSpec((None, tile_hw, KC), lambda n, h: (n, h, 0)),
                pl.BlockSpec((KC, C2p), lambda n, h: (0, 0)),
                pl.BlockSpec((1, C2p), lambda n, h: (0, 0)),
            ],
            out_specs=pl.BlockSpec((None, tile_hw, C2p), lambda n, h: (n, h, 0)),
        ),
        compiler_params=pltpu.CompilerParams(
            dimension_semantics=("parallel", "parallel"),
            vmem_limit_bytes=vmem_limit_bytes),
    )(patches, w_mat, b_pad)

    out = out[:, :HW, :C2].reshape(N, Ho, Wo, C2)
    return jnp.transpose(out, (0, 3, 1, 2))


def repconv_norelu(x_nchw, params, *, k, s=1, p=None, use_bf16=False,
                   force_im2col=False, vmem_limit_bytes=32 * 1024 * 1024):
    """Forward pass of RepConv_noRelu. x_nchw: (N, C1, H, W) float32."""
    if p is None:
        p = k // 2  # autopad
    # The branch fusion (and the original blend) requires the 1x1 branch's
    # output grid to coincide with the kxk branch's; that holds exactly for
    # odd k with "same" autopad p == k//2 (the module's default).
    assert k % 2 == 1 and p == k // 2, (
        "RepConv fusion requires odd k with p == k//2 (autopad default).")

    N, C1, H, W = x_nchw.shape
    C2 = params["wk"].shape[0]
    Ho = (H + 2 * p - k) // s + 1
    Wo = (W + 2 * p - k) // s + 1
    Wp = W + 2 * p
    C2p = _round_up(C2, 128)                               # lane-dense output
    compute_dtype = jnp.bfloat16 if use_bf16 else jnp.float32
    in_bytes = 2 if use_bf16 else 4

    w_full, b_fused = _fold_params(params, k)
    b_pad = jnp.pad(b_fused, ((0, 0), (0, C2p - C2))).astype(jnp.float32)

    # layout transform + spatial padding (plain JAX / XLA glue)
    x = jnp.transpose(x_nchw, (0, 2, 3, 1))                # NHWC
    xp = jnp.pad(x, ((0, 0), (p, p), (p, p), (0, 0)))

    if s == 1 and not force_im2col:
        return _forward_rows(
            xp, w_full, b_pad, k=k, Ho=Ho, Wo=Wo, Wp=Wp, C1=C1, C2=C2,
            C2p=C2p, compute_dtype=compute_dtype, in_bytes=in_bytes,
            tile_cap=256, vmem_limit_bytes=vmem_limit_bytes)
    return _forward_im2col(
        xp, w_full, b_pad, k=k, s=s, Ho=Ho, Wo=Wo, C1=C1, C2=C2, C2p=C2p,
        compute_dtype=compute_dtype, in_bytes=in_bytes,
        vmem_limit_bytes=vmem_limit_bytes)


# ---------------------------------------------------------------------------
# Pure-JAX reference (mirrors the PyTorch forward, inference BN)
# ---------------------------------------------------------------------------

def repconv_norelu_reference(x_nchw, params, *, k, s=1, p=None):
    if p is None:
        p = k // 2
    eps = params["eps"]

    def bn(y, gamma, beta, mean, var):
        g = gamma.reshape(1, -1, 1, 1)
        b = beta.reshape(1, -1, 1, 1)
        m = mean.reshape(1, -1, 1, 1)
        v = var.reshape(1, -1, 1, 1)
        return (y - m) / jnp.sqrt(v + eps) * g + b

    y1 = lax.conv_general_dilated(
        x_nchw, params["wk"], window_strides=(s, s),
        padding=[(p, p), (p, p)], dimension_numbers=("NCHW", "OIHW", "NCHW"))
    y1 = bn(y1, params["g1"], params["b1"], params["m1"], params["v1"])

    y2 = lax.conv_general_dilated(
        x_nchw, params["w1"], window_strides=(s, s),
        padding=[(0, 0), (0, 0)], dimension_numbers=("NCHW", "OIHW", "NCHW"))
    y2 = bn(y2, params["g2"], params["b2"], params["m2"], params["v2"])

    a = params["alpha"][0]
    return a * y1 + (1.0 - a) * y2


def make_params(key, c1, c2, k):
    ks = jax.random.split(key, 10)
    wk = 0.1 * jax.random.normal(ks[0], (c2, c1, k, k), jnp.float32)
    # 1x1 conv weight initialized to (identity + 1e-6), as in __init__
    ident = jnp.eye(max(c1, c2), dtype=jnp.float32) + 1e-6
    w1 = ident[:c2, :c1].reshape(c2, c1, 1, 1)
    g1 = 1.0 + 0.1 * jax.random.normal(ks[1], (c2,), jnp.float32)
    b1 = 0.1 * jax.random.normal(ks[2], (c2,), jnp.float32)
    m1 = 0.1 * jax.random.normal(ks[3], (c2,), jnp.float32)
    v1 = 0.5 + jnp.abs(jax.random.normal(ks[4], (c2,), jnp.float32))
    g2 = 1.0 + 0.1 * jax.random.normal(ks[5], (c2,), jnp.float32)
    b2 = 0.1 * jax.random.normal(ks[6], (c2,), jnp.float32)
    m2 = 0.1 * jax.random.normal(ks[7], (c2,), jnp.float32)
    v2 = 0.5 + jnp.abs(jax.random.normal(ks[8], (c2,), jnp.float32))
    # conv_alpha is a learnable Parameter; __init__ sets 1.0 — use 0.75 here
    # so both branches of the blend are exercised.
    alpha = jnp.array([0.75], jnp.float32)
    return dict(wk=wk, w1=w1, g1=g1, b1=b1, m1=m1, v1=v1,
                g2=g2, b2=b2, m2=m2, v2=v2, alpha=alpha, eps=1e-5)


if __name__ == "__main__":
    N, C1, C2, H, W = 2, 4, 4, 16, 16
    K = 3

    key = jax.random.PRNGKey(0)
    kx, kp = jax.random.split(key)
    x = jax.random.normal(kx, (N, C1, H, W), jnp.float32)
    params = make_params(kp, C1, C2, K)

    # stride-1 fast path (row-tap kernel), f32
    ref1 = repconv_norelu_reference(x, params, k=K, s=1)
    fwd1 = jax.jit(functools.partial(repconv_norelu, k=K, s=1))
    out1 = jax.block_until_ready(fwd1(x, params))
    assert out1.shape == ref1.shape == (N, C2, H, W)
    assert jnp.allclose(out1, ref1, atol=1e-4, rtol=1e-4), (
        float(jnp.max(jnp.abs(out1 - ref1))))

    # stride-1 fast path, bf16 inputs / f32 accumulation (looser tolerance)
    fwd1b = jax.jit(functools.partial(repconv_norelu, k=K, s=1, use_bf16=True))
    out1b = jax.block_until_ready(fwd1b(x, params))
    assert jnp.allclose(out1b, ref1, atol=5e-2, rtol=5e-2), (
        float(jnp.max(jnp.abs(out1b - ref1))))

    # stride-2 exercises the full-im2col GEMM fallback kernel
    ref2 = repconv_norelu_reference(x, params, k=K, s=2)
    fwd2 = jax.jit(functools.partial(repconv_norelu, k=K, s=2))
    out2 = jax.block_until_ready(fwd2(x, params))
    assert out2.shape == ref2.shape
    assert jnp.allclose(out2, ref2, atol=1e-4, rtol=1e-4), (
        float(jnp.max(jnp.abs(out2 - ref2))))

    print("KERNEL_OK")
</pallas_src>

<mosaic_0001>
module attributes {stable_mosaic.version = 11 : i64} {
  func.func @_repconv_rows_kernel(%arg0: i32, %arg1: i32, %arg2: memref<1x16x18x12xf32, #tpu.memory_space<vmem>>, %arg3: memref<3x12x128xf32, #tpu.memory_space<vmem>>, %arg4: memref<1x128xf32, #tpu.memory_space<vmem>>, %arg5: memref<1x256x128xf32, #tpu.memory_space<vmem>>) attributes {dimension_semantics = [#tpu.dimension_semantics<parallel>, #tpu.dimension_semantics<parallel>], iteration_bounds = array<i64: 2, 1>, scalar_prefetch = 0 : i64, scratch_operands = 0 : i64, tpu.core_type = #tpu.core_type<tc>, window_params = [{transform_indices = @transform_0, window_bounds = array<i64: 1, 16, 18, 12>}, {pipeline_mode = #tpu.pipeline_mode<synchronous>, transform_indices = @transform_1, window_bounds = array<i64: 3, 12, 128>}, {pipeline_mode = #tpu.pipeline_mode<synchronous>, transform_indices = @transform_2, window_bounds = array<i64: 1, 128>}, {transform_indices = @transform_3, window_bounds = array<i64: 1, 256, 128>}]} {
    %c0 = arith.constant 0 : index
    %c0_0 = arith.constant 0 : index
    %c0_1 = arith.constant 0 : index
    %c0_2 = arith.constant 0 : index
    %0 = vector.load %arg2[%c0, %c0_0, %c0_1, %c0_2] : memref<1x16x18x12xf32, #tpu.memory_space<vmem>>, vector<1x16x18x12xf32>
    %1 = vector.shape_cast %0 : vector<1x16x18x12xf32> to vector<16x18x12xf32>
    %cst = arith.constant 0.000000e+00 : f32
    %2 = vector.broadcast %cst : f32 to vector<256x128xf32>
    %3 = vector.extract_strided_slice %1 {offsets = [0, 0, 0], sizes = [16, 16, 12], strides = [1, 1, 1]} : vector<16x18x12xf32> to vector<16x16x12xf32>
    %4 = vector.shape_cast %3 : vector<16x16x12xf32> to vector<256x12xf32>
    %c0_3 = arith.constant 0 : index
    %c0_4 = arith.constant 0 : index
    %c0_5 = arith.constant 0 : index
    %5 = vector.load %arg3[%c0_3, %c0_4, %c0_5] : memref<3x12x128xf32, #tpu.memory_space<vmem>>, vector<1x12x128xf32>
    %6 = vector.shape_cast %5 : vector<1x12x128xf32> to vector<12x128xf32>
    %cst_6 = arith.constant dense<0.000000e+00> : vector<256x128xf32>
    %7 = tpu.matmul %4, %6, %cst_6 {dimension_numbers = #tpu.dot_dimension_numbers<[1], [0], [0], [1], [0, 0, 1, 1], [], []>} : vector<256x12xf32>, vector<12x128xf32>, vector<256x128xf32> -> vector<256x128xf32>
    %8 = arith.addf %2, %7 : vector<256x128xf32>
    %9 = vector.extract_strided_slice %1 {offsets = [0, 1, 0], sizes = [16, 16, 12], strides = [1, 1, 1]} : vector<16x18x12xf32> to vector<16x16x12xf32>
    %10 = vector.shape_cast %9 : vector<16x16x12xf32> to vector<256x12xf32>
    %c1 = arith.constant 1 : index
    %c0_7 = arith.constant 0 : index
    %c0_8 = arith.constant 0 : index
    %11 = vector.load %arg3[%c1, %c0_7, %c0_8] : memref<3x12x128xf32, #tpu.memory_space<vmem>>, vector<1x12x128xf32>
    %12 = vector.shape_cast %11 : vector<1x12x128xf32> to vector<12x128xf32>
    %cst_9 = arith.constant dense<0.000000e+00> : vector<256x128xf32>
    %13 = tpu.matmul %10, %12, %cst_9 {dimension_numbers = #tpu.dot_dimension_numbers<[1], [0], [0], [1], [0, 0, 1, 1], [], []>} : vector<256x12xf32>, vector<12x128xf32>, vector<256x128xf32> -> vector<256x128xf32>
    %14 = arith.addf %8, %13 : vector<256x128xf32>
    %15 = vector.extract_strided_slice %1 {offsets = [0, 2, 0], sizes = [16, 16, 12], strides = [1, 1, 1]} : vector<16x18x12xf32> to vector<16x16x12xf32>
    %16 = vector.shape_cast %15 : vector<16x16x12xf32> to vector<256x12xf32>
    %c2 = arith.constant 2 : index
    %c0_10 = arith.constant 0 : index
    %c0_11 = arith.constant 0 : index
    %17 = vector.load %arg3[%c2, %c0_10, %c0_11] : memref<3x12x128xf32, #tpu.memory_space<vmem>>, vector<1x12x128xf32>
    %18 = vector.shape_cast %17 : vector<1x12x128xf32> to vector<12x128xf32>
    %cst_12 = arith.constant dense<0.000000e+00> : vector<256x128xf32>
    %19 = tpu.matmul %16, %18, %cst_12 {dimension_numbers = #tpu.dot_dimension_numbers<[1], [0], [0], [1], [0, 0, 1, 1], [], []>} : vector<256x12xf32>, vector<12x128xf32>, vector<256x128xf32> -> vector<256x128xf32>
    %20 = arith.addf %14, %19 : vector<256x128xf32>
    %c0_13 = arith.constant 0 : index
    %c0_14 = arith.constant 0 : index
    %21 = vector.load %arg4[%c0_13, %c0_14] : memref<1x128xf32, #tpu.memory_space<vmem>>, vector<1x128xf32>
    %22 = vector.broadcast %21 : vector<1x128xf32> to vector<256x128xf32>
    %23 = arith.addf %20, %22 : vector<256x128xf32>
    %c0_15 = arith.constant 0 : index
    %c0_16 = arith.constant 0 : index
    %c0_17 = arith.constant 0 : index
    %24 = vector.load %arg5[%c0_15, %c0_16, %c0_17] : memref<1x256x128xf32, #tpu.memory_space<vmem>>, vector<1x256x128xf32>
    %25 = vector.shape_cast %24 : vector<1x256x128xf32> to vector<256x128xf32>
    %26 = vector.shape_cast %23 : vector<256x128xf32> to vector<1x256x128xf32>
    tpu.vector_store %arg5[%c0_15, %c0_16, %c0_17], %26 {strides = array<i32>} : memref<1x256x128xf32, #tpu.memory_space<vmem>>, vector<1x256x128xf32>,
    return
  }
  func.func @transform_0(%arg0: i32, %arg1: i32) -> (i32, i32, i32, i32) {
    %c0_i32 = arith.constant 0 : i32
    %c0_i32_0 = arith.constant 0 : i32
    %c0_i32_1 = arith.constant 0 : i32
    return %arg0, %arg1, %c0_i32, %c0_i32_0 : i32, i32, i32, i32
  }
  func.func @transform_1(%arg0: i32, %arg1: i32) -> (i32, i32, i32) {
    %c0_i32 = arith.constant 0 : i32
    %c0_i32_0 = arith.constant 0 : i32
    %c0_i32_1 = arith.constant 0 : i32
    %c0_i32_2 = arith.constant 0 : i32
    return %c0_i32, %c0_i32_0, %c0_i32_1 : i32, i32, i32
  }
  func.func @transform_2(%arg0: i32, %arg1: i32) -> (i32, i32) {
    %c0_i32 = arith.constant 0 : i32
    %c0_i32_0 = arith.constant 0 : i32
    %c0_i32_1 = arith.constant 0 : i32
    return %c0_i32, %c0_i32_0 : i32, i32
  }
  func.func @transform_3(%arg0: i32, %arg1: i32) -> (i32, i32, i32) {
    %c0_i32 = arith.constant 0 : i32
    %c0_i32_0 = arith.constant 0 : i32
    return %arg0, %arg1, %c0_i32 : i32, i32, i32
  }
}

</mosaic_0001>

<bundles_post_ra>
// kernel: repconv_norelu.1
= control target key start
LH: loop header
LB: loop body
LE: loop exit
PB: predicated region body
PF: predicated region fallthrough
CT: control target
= control target key end

     0   :  { %s2078_s12 = smov 0   ;;  %s2080_s13 = smov 0   ;;  %s2658_s0 = inlined_call_operand.vmem [shape: f32[2,16,18,12], index: 0, kind: input, shape index: {}]   ;;  %s2659_s1 = inlined_call_operand.vmem [shape: f32[3,12,128], index: 1, kind: input, shape index: {}]   ;;  %s2660_s2 = inlined_call_operand.vmem [shape: f32[1,128], index: 2, kind: input, shape index: {}]   ;;  %s2661_s3 = inlined_call_operand.vmem [shape: f32[2,256,128], index: 3, kind: output, shape index: {}]  }
   0x1   :  { %s2082_s14 = smov 0  }
   0x2 LB: > { %s25_s15 = sadd.s32 1, %s2051_s13  ;;  %p1554_p0 = scmp.ge.s32.totalorder %s2055_s14, 1  ;;  %s2055_s14 = sphi %s2082_s14, %s13_s14   ;;  %s2051_s13 = sphi %s2080_s13, %s2665_s13   ;;  %s2047_s12 = sphi %s2078_s12, %s2664_s12  }
   0x3   : > { %p27_p1 = scmp.ge.s32.totalorder %s25_s15, 2  ;;  %p159_p2 = scmp.lt.s32.totalorder %s2055_s14, 3 }
   0x5   : > { %s2667_s15 = smov (%p27_p1, %s25_s15), 0  ;;  %p160_p3 = pnand %p1554_p0, %p159_p2 }
   0x6   : > { %v261_v0 = vld [vmem:[%s2659_s1] sm:$0xff] (!%p160_p3)  ;;  %v262_v1 = vld [vmem:[%s2659_s1 + $0x8] sm:$0xf] (!%p160_p3)  ;;  %vm460_vm0 = vcmask (!%p160_p3), 1043456   ;;  %v1558_v2 = vld [vmem:[%s2659_s1 + $0x10] sm:$0xff] (!%p160_p3)  ;;  %vm2057_vm1 = vmmov (!%p160_p3), 1  }
   0x7   : > { %163 = sbr.rel (%p160_p3) target bundleno = 333 (0x14d), region = 32  ;;  %vm2105_vm2 = vmpackc.low (!%p160_p3), %vm460_vm0, %vm2057_vm1  ;;  %v1929_v4 = vpack.c.bf16 (!%p160_p3), %v262_v1, %v261_v0  ;;  %v1559_v5 = vld [vmem:[%s2659_s1 + $0x18] sm:$0xf] (!%p160_p3)  ;;  %p193_p4 = scmp.lt.s32.totalorder (!%p160_p3), %s2047_s12, 1  ;;  %v1626_v6 = vld [vmem:[%s2659_s1 + $0x20] sm:$0xff] (!%p160_p3)  ;;  %vm395_vm3 = vcmask (!%p160_p3), 97280  }
   0x8   : > { %v1923_v7 = vpack.c.bf16 (!%p160_p3), %v1559_v5, %v1558_v2  ;;  %v1627_v8 = vld [vmem:[%s2659_s1 + $0x28] sm:$0xf] (!%p160_p3)  ;;  %vm311_vm4 = vcmask (!%p160_p3), 1046528   ;;  %vm981_vm5 = vcmask (!%p160_p3), 1045504  }
   0x9   : > { %1931 = vmatprep.subr.msk.bf16.mxu0 (!%p160_p3), %vm2105_vm2, %v1929_v4  ;;  %v1935_v9 = vpack.c.bf16 (!%p160_p3), %v1627_v8, %v1626_v6 }
   0xa   : > { %1934 = vmatpush3.bf16.msk.msra.mxu0 (!%p160_p3), %vm2105_vm2, %v1929_v4  ;;  %1925 = vmatprep.subr.msk.bf16.mxu1 (!%p160_p3), %vm2105_vm2, %v1923_v7 }
   0xb   : > { %1928 = vmatpush3.bf16.msk.msra.mxu1 (!%p160_p3), %vm2105_vm2, %v1923_v7  ;;  %1937 = vmatprep.subr.msk.bf16.mxu0 (!%p160_p3), %vm2105_vm2, %v1935_v9 }
   0xc   : > { %1941 = vmatprep.subr.msk.bf16.mxu1 (!%p160_p3), %vm2105_vm2, %v1929_v4 }
   0xe   : > { %s2669_s12 = smov (!%p193_p4, %s2047_s12), 1 }
   0xf   : > { %s2007_s28 = smul.u32 384, %s2669_s12  ;;  %s1664_s5 = sshll.u32 %s2669_s12, 8 }
  0x10   : > { %s2583_s10 = scalar_lea.vmem %s2661_s3, %s1664_s5 }
  0x11   : > { %s2136_s4 = scalar_lea.vmem %s2658_s0, %s2007_s28 }
  0x12   : > { %v2139_v10 = vld [vmem:[%s2136_s4] sm:$0xff]  ;;  %v2142_v11 = vld [vmem:[%s2136_s4 + $0x8] sm:$0xff]  ;;  %v2145_v12 = vld [vmem:[%s2136_s4 + $0x10] sm:$0x3] }
  0x13   : > { %v312_v13 = vrot.slane %v2139_v10, 1  ;;  %1823 = vmatprep.mubr.msk.f32.mxu0 %vm395_vm3, %v2139_v10  ;;  %v313_v14 = vrot.slane %v2142_v11, 1  ;;  %v2152_v15 = vld [vmem:[%s2136_s4 + $0x18] sm:$0xff]  ;;  %v2155_v16 = vld [vmem:[%s2136_s4 + $0x20] sm:$0xff]  ;;  %v315_v17 = vrot.slane %v2145_v12, 1  ;;  %v2172_v23 = vld [vmem:[%s2136_s4 + $0x30] sm:$0xff] }
  0x14   : > { %1824 = vmatmul.mubr.msk.f32.vlgmr.msra.gmra.mrb[0].mxu0 %vm395_vm3, %v2142_v11  ;;  %v317_v18 = vrot.slane %v2152_v15, 1  ;;  %v2162_v19 = vld [vmem:[%s2136_s4 + $0x28] sm:$0x3]  ;;  %v318_v21 = vrot.slane %v2155_v16, 1  ;;  %v2175_v24 = vld [vmem:[%s2136_s4 + $0x38] sm:$0xff]  ;;  %v322_v26 = vrot.slane %v2172_v23, 1 }
  0x15   : > { %v314_v20 = vsel %vm311_vm4, %v312_v13, %v313_v14  ;;  %1826 = vmatprep.mubr.msk.f32.mxu0 %vm395_vm3, %v2152_v15  ;;  %1940 = vmatpush3.bf16.msk.msra.mxu0 %vm2105_vm2, %v1935_v9  ;;  %v320_v22 = vrot.slane %v2162_v19, 1  ;;  %v316_v25 = vsel %vm311_vm4, %v313_v14, %v315_v17  ;;  %v323_v27 = vrot.slane %v2175_v24, 1  ;;  %v2182_v28 = vld [vmem:[%s2136_s4 + $0x40] sm:$0x3]  ;;  %v2185_v29 = vld [vmem:[%s2136_s4 + $0x48] sm:$0xff]  ;;  %v2188_v30 = vld [vmem:[%s2136_s4 + $0x50] sm:$0xff] }
  0x16   : > { %1771 = vmatprep.mubr.msk.f32.mxu1 %vm395_vm3, %v314_v20  ;;  %v319_v31 = vsel %vm311_vm4, %v317_v18, %v318_v21  ;;  %v325_v33 = vrot.slane %v2182_v28, 1  ;;  %v327_v35 = vrot.slane %v2185_v29, 1  ;;  %v328_v36 = vrot.slane %v2188_v30, 1  ;;  %v2205_v37 = vld [vmem:[%s2136_s4 + $0x58] sm:$0x3]  ;;  %v2208_v38 = vld [vmem:[%s2136_s4 + $0x60] sm:$0xff] }
  0x17   : > { %1772 = vmatmul.mubr.msk.f32.vlgmr.msra.gmra.mrb[0].mxu1 %vm395_vm3, %v316_v25  ;;  %v321_v32 = vsel %vm311_vm4, %v318_v21, %v320_v22  ;;  %v324_v34 = vsel %vm311_vm4, %v322_v26, %v323_v27  ;;  %v2211_v39 = vld [vmem:[%s2136_s4 + $0x68] sm:$0xff]  ;;  %v330_v41 = vrot.slane %v2205_v37, 1  ;;  %v332_v43 = vrot.slane %v2208_v38, 1  ;;  %v2225_v45 = vld [vmem:[%s2136_s4 + $0x70] sm:$0x3]  ;;  %v2228_v46 = vld [vmem:[%s2136_s4 + $0x78] sm:$0xff] }
  0x18   : > { %1942 = vmatpush3.bf16.msk.msra.mxu1 %vm2105_vm2, %v1929_v4  ;;  %1827 = vmatmul.mubr.msk.f32.gmra.mrb[2].mxu0 %vm395_vm3, %v2155_v16  ;;  %v326_v40 = vsel %vm311_vm4, %v323_v27, %v325_v33  ;;  %v329_v42 = vsel %vm311_vm4, %v327_v35, %v328_v36  ;;  %v333_v44 = vrot.slane %v2211_v39, 1  ;;  %v2231_v47 = vld [vmem:[%s2136_s4 + $0x80] sm:$0xff]  ;;  %v335_v49 = vrot.slane %v2225_v45, 1  ;;  %v2245_v53 = vld [vmem:[%s2136_s4 + $0x88] sm:$0x3]  ;;  %v2248_v54 = vld [vmem:[%s2136_s4 + $0x90] sm:$0xff] }
  0x19   : > { %1774 = vmatprep.mubr.msk.f32.mxu1 %vm395_vm3, %v319_v31  ;;  %1829 = vmatprep.mubr.msk.f32.mxu0 %vm395_vm3, %v2172_v23  ;;  %v331_v48 = vsel %vm311_vm4, %v328_v36, %v330_v41  ;;  %v337_v51 = vrot.slane %v2228_v46, 1  ;;  %v338_v52 = vrot.slane %v2231_v47, 1  ;;  %v2251_v55 = vld [vmem:[%s2136_s4 + $0x98] sm:$0xff]  ;;  %v340_v57 = vrot.slane %v2245_v53, 1  ;;  %v2265_v61 = vld [vmem:[%s2136_s4 + $0xa0] sm:$0x3] }
  0x1a   : > { %v334_v50 = vsel %vm311_vm4, %v332_v43, %v333_v44  ;;  %v336_v56 = vsel %vm311_vm4, %v333_v44, %v335_v49  ;;  %v342_v59 = vrot.slane %v2248_v54, 1  ;;  %v343_v60 = vrot.slane %v2251_v55, 1  ;;  %v2268_v62 = vld [vmem:[%s2136_s4 + $0xa8] sm:$0xff]  ;;  %v2271_v63 = vld [vmem:[%s2136_s4 + $0xb0] sm:$0xff]  ;;  %v2285_v5 = vld [vmem:[%s2136_s4 + $0xb8] sm:$0x3] }
  0x1b   : > { %1775 = vmatmul.mubr.msk.f32.gmra.mrb[2].mxu1 %vm395_vm3, %v321_v32  ;;  %v339_v58 = vsel %vm311_vm4, %v337_v51, %v338_v52  ;;  %v341_v0 = vsel %vm311_vm4, %v338_v52, %v340_v57  ;;  %v345_v1 = vrot.slane %v2265_v61, 1  ;;  %v347_v3 = vrot.slane %v2268_v62, 1  ;;  %v2290_v8 = vld [vmem:[%s2136_s4 + $0xc0] sm:$0xff]  ;;  %v2293_v9 = vld [vmem:[%s2136_s4 + $0xc8] sm:$0xff]  ;;  %v2308_v20 = vld [vmem:[%s2136_s4 + $0xd0] sm:$0x3] }
  0x1c   : > { %1830 = vmatmul.mubr.msk.f32.gmra.mrb[4].mxu0 %vm395_vm3, %v2175_v24  ;;  %1777 = vmatprep.mubr.msk.f32.mxu1 %vm395_vm3, %v324_v34  ;;  %v344_v2 = vsel %vm311_vm4, %v342_v59, %v343_v60  ;;  %v348_v4 = vrot.slane %v2271_v63, 1  ;;  %v982_v6 = vrot.slane %v2139_v10, 2  ;;  %v983_v7 = vrot.slane %v2142_v11, 2  ;;  %v2314_v25 = vld [vmem:[%s2136_s4 + $0xd8] sm:$0xff]  ;;  %v2317_v26 = vld [vmem:[%s2136_s4 + $0xe0] sm:$0xff] }
  0x1d   : > { %1832 = vmatprep.mubr.msk.f32.mxu0 %vm395_vm3, %v2185_v29  ;;  %v985_v13 = vrot.slane %v2145_v12, 2  ;;  %v346_v10 = vsel %vm311_vm4, %v343_v60, %v345_v1  ;;  %v350_v11 = vrot.slane %v2285_v5, 1  ;;  %v352_v17 = vrot.slane %v2290_v8, 1  ;;  %v2332_v35 = vld [vmem:[%s2136_s4 + $0xe8] sm:$0x3]  ;;  %v2341_v43 = vld [vmem:[%s2136_s4 + $0xf8] sm:$0xff] }
  0x1e   : > { %v349_v14 = vsel %vm311_vm4, %v347_v3, %v348_v4  ;;  %v353_v18 = vrot.slane %v2293_v9, 1  ;;  %v987_v12 = vrot.slane %v2152_v15, 2  ;;  %v988_v21 = vrot.slane %v2155_v16, 2  ;;  %v2355_v51 = vld [vmem:[%s2136_s4 + $0x100] sm:$0x3] }
  0x1f   : > { %1778 = vmatmul.mubr.msk.f32.gmra.mrb[4].mxu1 %vm395_vm3, %v326_v40  ;;  %v984_v22 = vsel %vm981_vm5, %v982_v6, %v983_v7  ;;  %v351_v15 = vsel %vm311_vm4, %v348_v4, %v350_v11  ;;  %v986_v27 = vsel %vm981_vm5, %v983_v7, %v985_v13  ;;  %v355_v16 = vrot.slane %v2308_v20, 1  ;;  %v2378_v3 = vld [vmem:[%s2136_s4 + $0x118] sm:$0x3]  ;;  %v2384_v13 = vld [vmem:[%s2136_s4 + $0x120] sm:$0xff] }
  0x20   : > { %1833 = vmatmul.mubr.msk.f32.gmra.mrb[6].mxu0 %vm395_vm3, %v2188_v30  ;;  %1780 = vmatprep.mubr.msk.f32.mxu1 %vm395_vm3, %v329_v42  ;;  %v354_v31 = vsel %vm311_vm4, %v352_v17, %v353_v18  ;;  %v990_v32 = vrot.slane %v2162_v19, 2  ;;  %v357_v33 = vrot.slane %v2314_v25, 1  ;;  %v358_v34 = vrot.slane %v2317_v26, 1  ;;  %v2338_v42 = vld [vmem:[%s2136_s4 + $0xf0] sm:$0xff] }
  0x21   : > { %1835 = vmatprep.mubr.msk.f32.mxu0 %vm395_vm3, %v2208_v38  ;;  %v992_v36 = vrot.slane %v2172_v23, 2  ;;  %v993_v40 = vrot.slane %v2175_v24, 2  ;;  %v989_v41 = vsel %vm981_vm5, %v987_v12, %v988_v21  ;;  %v356_v19 = vsel %vm311_vm4, %v353_v18, %v355_v16  ;;  %v2401_v12 = vld [vmem:[%s2136_s4 + $0x130] sm:$0x3] }
  0x22   : > { %v360_v23 = vrot.slane %v2332_v35, 1  ;;  %v995_v24 = vrot.slane %v2182_v28, 2  ;;  %v991_v44 = vsel %vm981_vm5, %v988_v21, %v990_v32  ;;  %v362_v49 = vrot.slane %v2338_v42, 1  ;;  %v2361_v28 = vld [vmem:[%s2136_s4 + $0x108] sm:$0xff] }
  0x23   : > { %1781 = vmatmul.mubr.msk.f32.gmra.mrb[6].mxu1 %vm395_vm3, %v331_v48  ;;  %v359_v48 = vsel %vm311_vm4, %v357_v33, %v358_v34  ;;  %v997_v52 = vrot.slane %v2185_v29, 2  ;;  %v994_v57 = vsel %vm981_vm5, %v992_v36, %v993_v40  ;;  %v367_v1 = vrot.slane %v2361_v28, 1  ;;  %v2424_v36 = vld [vmem:[%s2136_s4 + $0x148] sm:$0x3] }
  0x24   : > { %1836 = vmatmul.mubr.msk.f32.gmra.mrb[8].mxu0 %vm395_vm3, %v2211_v39  ;;  %1783 = vmatprep.mubr.msk.f32.mxu1 %vm395_vm3, %v334_v50  ;;  %v363_v50 = vrot.slane %v2341_v43, 1  ;;  %v361_v59 = vsel %vm311_vm4, %v358_v34, %v360_v23  ;;  %v996_v29 = vsel %vm981_vm5, %v993_v40, %v995_v24  ;;  %v1002_v4 = vrot.slane %v2208_v38, 2  ;;  %v2430_v23 = vld [vmem:[%s2136_s4 + $0x150] sm:$0xff]  ;;  %v2433_v24 = vld [vmem:[%s2136_s4 + $0x158] sm:$0xff] }
  0x25   : > { %1838 = vmatprep.mubr.msk.f32.mxu0 %vm395_vm3, %v2228_v46  ;;  %v1003_v6 = vrot.slane %v2211_v39, 2  ;;  %v370_v38 = vrot.slane %v2378_v3, 1  ;;  %v1005_v39 = vrot.slane %v2225_v45, 2  ;;  %v372_v17 = vrot.slane %v2384_v13, 1  ;;  %v2407_v45 = vld [vmem:[%s2136_s4 + $0x138] sm:$0xff] }
  0x26   : > { %v364_v60 = vsel %vm311_vm4, %v362_v49, %v363_v50  ;;  %v1007_v21 = vrot.slane %v2228_v46, 2  ;;  %v1010_v32 = vrot.slane %v2245_v53, 2  ;;  %v377_v33 = vrot.slane %v2407_v45, 1 }
  0x27   : > { %1784 = vmatmul.mubr.msk.f32.gmra.mrb[8].mxu1 %vm395_vm3, %v336_v56  ;;  %v998_v56 = vrot.slane %v2188_v30, 2  ;;  %v365_v30 = vrot.slane %v2355_v51, 1  ;;  %v1006_v46 = vsel %vm981_vm5, %v1003_v6, %v1005_v39  ;;  %v1012_v40 = vrot.slane %v2248_v54, 2 }
  0x28   : > { %1839 = vmatmul.mubr.msk.f32.gmra.mrb[10].mxu0 %vm395_vm3, %v2231_v47  ;;  %1786 = vmatprep.mubr.msk.f32.mxu1 %vm395_vm3, %v339_v58  ;;  %v2364_v58 = vld [vmem:[%s2136_s4 + $0x110] sm:$0xff]  ;;  %v382_v49 = vrot.slane %v2430_v23, 1 }
  0x29   : > { %1841 = vmatprep.mubr.msk.f32.mxu0 %vm395_vm3, %v2248_v54  ;;  %v999_v7 = vsel %vm981_vm5, %v997_v52, %v998_v56  ;;  %v380_v54 = vrot.slane %v2424_v36, 1  ;;  %v2447_v52 = vld [vmem:[%s2136_s4 + $0x160] sm:$0x3] }
  0x2b   : > { %1787 = vmatmul.mubr.msk.f32.gmra.mrb[10].mxu1 %vm395_vm3, %v341_v0  ;;  %v1000_v0 = vrot.slane %v2205_v37, 2  ;;  %v366_v37 = vsel %vm311_vm4, %v363_v50, %v365_v30  ;;  %v383_v50 = vrot.slane %v2433_v24, 1 }
  0x2c   : > { %1842 = vmatmul.mubr.msk.f32.gmra.mrb[12].mxu0 %vm395_vm3, %v2251_v55  ;;  %1789 = vmatprep.mubr.msk.f32.mxu1 %vm395_vm3, %v344_v2  ;;  %v368_v2 = vrot.slane %v2364_v58, 1 }
  0x2d   : > { %1844 = vmatprep.mubr.msk.f32.mxu0 %vm395_vm3, %v2268_v62  ;;  %v1001_v11 = vsel %vm981_vm5, %v998_v56, %v1000_v0  ;;  %v1017_v56 = vrot.slane %v2268_v62, 2  ;;  %v385_v62 = vrot.slane %v2447_v52, 1  ;;  %v1020_v0 = vrot.slane %v2285_v5, 2 }
  0x2e   : > { %v371_v16 = vsel %vm311_vm4, %v368_v2, %v370_v38 }
  0x2f   : > { %1790 = vmatmul.mubr.msk.f32.gmra.mrb[12].mxu1 %vm395_vm3, %v346_v10  ;;  %v2387_v10 = vld [vmem:[%s2136_s4 + $0x128] sm:$0xff]  ;;  %v386_v5 = vsel %vm311_vm4, %v383_v50, %v385_v62 }
  0x30   : > { %1845 = vmatmul.mubr.msk.f32.gmra.mrb[14].mxu0 %vm395_vm3, %v2271_v63  ;;  %1792 = vmatprep.mubr.msk.f32.mxu1 %vm395_vm3, %v349_v14  ;;  %v369_v14 = vsel %vm311_vm4, %v367_v1, %v368_v2  ;;  %v373_v18 = vrot.slane %v2387_v10, 1 }
  0x31   : > { %1875 = vmatprep.mubr.msk.f32.mxu0 %vm395_vm3, %v984_v22  ;;  %v1008_v22 = vrot.slane %v2231_v47, 2  ;;  %v375_v47 = vrot.slane %v2401_v12, 1 }
  0x33   : > { %1793 = vmatmul.mubr.msk.f32.gmra.mrb[14].mxu1 %vm395_vm3, %v351_v15  ;;  %v1004_v15 = vsel %vm981_vm5, %v1002_v4, %v1003_v6  ;;  %v376_v53 = vsel %vm311_vm4, %v373_v18, %v375_v47  ;;  %v2470_v4 = vld [vmem:[%s2136_s4 + $0x178] sm:$0x3]  ;;  %v1033_v47 = vrot.slane %v2341_v43, 2 }
  0x34   : > { %1876 = vmatmul.mubr.msk.f32.vlgmr.msra.gmra.mrb[0].mxu0 %vm395_vm3, %v986_v27  ;;  %1795 = vmatprep.mubr.msk.f32.mxu1 %vm395_vm3, %v354_v31  ;;  %v2410_v27 = vld [vmem:[%s2136_s4 + $0x140] sm:$0xff]  ;;  %v374_v31 = vsel %vm311_vm4, %v372_v17, %v373_v18  ;;  %v390_v38 = vrot.slane %v2470_v4, 1  ;;  %v1027_v18 = vrot.slane %v2314_v25, 2 }
  0x35   : > { %1878 = vmatprep.mubr.msk.f32.mxu0 %vm395_vm3, %v989_v41  ;;  %v378_v34 = vrot.slane %v2410_v27, 1  ;;  %v1013_v41 = vrot.slane %v2251_v55, 2  ;;  %v1015_v55 = vrot.slane %v2265_v61, 2  ;;  %v2453_v61 = vld [vmem:[%s2136_s4 + $0x168] sm:$0xff] }
  0x36   : > { %v387_v1 = vrot.slane %v2453_v61, 1 }
  0x37   : > { %1796 = vmatmul.mubr.msk.f32.gmra.mrb[16].mxu1 %vm395_vm3, %v356_v19  ;;  %v1009_v19 = vsel %vm981_vm5, %v1007_v21, %v1008_v22  ;;  %v381_v30 = vsel %vm311_vm4, %v378_v34, %v380_v54  ;;  %v1028_v21 = vrot.slane %v2317_v26, 2  ;;  %v1048_v54 = vrot.slane %v2410_v27, 2 }
  0x38   : > { %1879 = vmatmul.mubr.msk.f32.gmra.mrb[2].mxu0 %vm395_vm3, %v991_v44  ;;  %1798 = vmatprep.mubr.msk.f32.mxu1 %vm395_vm3, %v359_v48  ;;  %v1011_v44 = vsel %vm981_vm5, %v1008_v22, %v1010_v32  ;;  %v379_v48 = vsel %vm311_vm4, %v377_v33, %v378_v34  ;;  %v1035_v32 = vrot.slane %v2355_v51, 2  ;;  %v1037_v33 = vrot.slane %v2361_v28, 2 }
  0x39   : > { %1881 = vmatprep.mubr.msk.f32.mxu0 %vm395_vm3, %v994_v57  ;;  %v1018_v57 = vrot.slane %v2271_v63, 2  ;;  %v384_v63 = vsel %vm311_vm4, %v382_v49, %v383_v50  ;;  %v1038_v34 = vrot.slane %v2364_v58, 2  ;;  %v1040_v51 = vrot.slane %v2378_v3, 2 }
  0x3b   : > { %1799 = vmatmul.mubr.msk.f32.gmra.mrb[18].mxu1 %vm395_vm3, %v361_v59  ;;  %v1014_v59 = vsel %vm981_vm5, %v1012_v40, %v1013_v41  ;;  %v1019_v6 = vsel %vm981_vm5, %v1017_v56, %v1018_v57  ;;  %v1021_v39 = vsel %vm981_vm5, %v1018_v57, %v1020_v0  ;;  %v1039_v40 = vsel %vm981_vm5, %v1037_v33, %v1038_v34 }
  0x3c   : > { %1882 = vmatmul.mubr.msk.f32.gmra.mrb[4].mxu0 %vm395_vm3, %v996_v29  ;;  %1801 = vmatprep.mubr.msk.f32.mxu1 %vm395_vm3, %v364_v60  ;;  %v2456_v29 = vld [vmem:[%s2136_s4 + $0x170] sm:$0xff]  ;;  %v1016_v60 = vsel %vm981_vm5, %v1013_v41, %v1015_v55  ;;  %v1042_v41 = vrot.slane %v2384_v13, 2  ;;  %v1052_v55 = vrot.slane %v2430_v23, 2 }
  0x3d   : > { %1884 = vmatprep.mubr.msk.f32.mxu0 %vm395_vm3, %v999_v7  ;;  %v388_v2 = vrot.slane %v2456_v29, 1  ;;  %v1022_v7 = vrot.slane %v2290_v8, 2  ;;  %v1058_v49 = vrot.slane %v2456_v29, 2 }
  0x3f   : > { %1802 = vmatmul.mubr.msk.f32.gmra.mrb[20].mxu1 %vm395_vm3, %v366_v37  ;;  %v1023_v37 = vrot.slane %v2293_v9, 2  ;;  %v391_v22 = vsel %vm311_vm4, %v388_v2, %v390_v38 }
  0x40   : > { %1885 = vmatmul.mubr.msk.f32.gmra.mrb[6].mxu0 %vm395_vm3, %v1001_v11  ;;  %1804 = vmatprep.mubr.msk.f32.mxu1 %vm395_vm3, %v369_v14  ;;  %v389_v11 = vsel %vm311_vm4, %v387_v1, %v388_v2  ;;  %v1025_v14 = vrot.slane %v2308_v20, 2  ;;  %v1030_v20 = vrot.slane %v2332_v35, 2 }
  0x41   : > { %1887 = vmatprep.mubr.msk.f32.mxu0 %vm395_vm3, %v1004_v15  ;;  %v1024_v17 = vsel %vm981_vm5, %v1022_v7, %v1023_v37 }
  0x42   : > { %v1026_v15 = vsel %vm981_vm5, %v1023_v37, %v1025_v14 }
  0x43   : > { %1805 = vmatmul.mubr.msk.f32.gmra.mrb[22].mxu1 %vm395_vm3, %v371_v16  ;;  %v1029_v16 = vsel %vm981_vm5, %v1027_v18, %v1028_v21 }
  0x44   : > { %1888 = vmatmul.mubr.msk.f32.gmra.mrb[8].mxu0 %vm395_vm3, %v1006_v46  ;;  %1807 = vmatprep.mubr.msk.f32.mxu1 %vm395_vm3, %v374_v31  ;;  %v1032_v46 = vrot.slane %v2338_v42, 2  ;;  %v1031_v31 = vsel %vm981_vm5, %v1028_v21, %v1030_v20 }
  0x45   : > { %1890 = vmatprep.mubr.msk.f32.mxu0 %vm395_vm3, %v1009_v19  ;;  %v1043_v19 = vrot.slane %v2387_v10, 2 }
  0x46   : > { %v1034_v35 = vsel %vm981_vm5, %v1032_v46, %v1033_v47 }
  0x47   : > { %1808 = vmatmul.mubr.msk.f32.gmra.mrb[24].mxu1 %vm395_vm3, %v376_v53  ;;  %v1044_v3 = vsel %vm981_vm5, %v1042_v41, %v1043_v19  ;;  %v1047_v53 = vrot.slane %v2407_v45, 2 }
  0x48   : > { %1891 = vmatmul.mubr.msk.f32.gmra.mrb[10].mxu0 %vm395_vm3, %v1011_v44  ;;  %1810 = vmatprep.mubr.msk.f32.mxu1 %vm395_vm3, %v379_v48  ;;  %v1053_v44 = vrot.slane %v2433_v24, 2  ;;  %v1057_v48 = vrot.slane %v2453_v61, 2 }
  0x49   : > { %1893 = vmatprep.mubr.msk.f32.mxu0 %vm395_vm3, %v1014_v59 }
  0x4a   : > { %v1059_v50 = vsel %vm981_vm5, %v1057_v48, %v1058_v49 }
  0x4b   : > { %1811 = vmatmul.mubr.msk.f32.gmra.mrb[26].mxu1 %vm395_vm3, %v381_v30 }
  0x4c   : > { %1894 = vmatmul.mubr.msk.f32.gmra.mrb[12].mxu0 %vm395_vm3, %v1016_v60  ;;  %1813 = vmatprep.mubr.msk.f32.mxu1 %vm395_vm3, %v384_v63 }
  0x4d   : > { %1896 = vmatprep.mubr.msk.f32.mxu0 %vm395_vm3, %v1019_v6 }
  0x4f   : > { %1814 = vmatmul.mubr.msk.f32.gmra.mrb[28].mxu1 %vm395_vm3, %v386_v5 }
  0x50   : > { %1897 = vmatmul.mubr.msk.f32.gmra.mrb[14].mxu0 %vm395_vm3, %v1021_v39  ;;  %1816 = vmatprep.mubr.msk.f32.mxu1 %vm395_vm3, %v389_v11 }
  0x51   : > { %1899 = vmatprep.mubr.msk.f32.mxu0 %vm395_vm3, %v1024_v17 }
  0x53   : > { %1817 = vmatmul.mubr.msk.f32.gmra.mrb[30].mxu1 %vm395_vm3, %v391_v22 }
  0x54   : > { %1847 = vmatprep.mubr.msk.f32.mxu1 %vm395_vm3, %v2290_v8  ;;  %1900 = vmatmul.mubr.msk.f32.gmra.mrb[16].mxu0 %vm395_vm3, %v1026_v15  ;;  %v1036_v8 = vsel %vm981_vm5, %v1033_v47, %v1035_v32 }
  0x55   : > { %1902 = vmatprep.mubr.msk.f32.mxu0 %vm395_vm3, %v1029_v16 }
  0x57   : > { %1848 = vmatmul.mubr.msk.f32.vlgmr.msra.gmra.mrb[16].mxu1 %vm395_vm3, %v2293_v9  ;;  %v1041_v9 = vsel %vm981_vm5, %v1038_v34, %v1040_v51 }
  0x58   : > { %1850 = vmatprep.mubr.msk.f32.mxu1 %vm395_vm3, %v2314_v25  ;;  %1903 = vmatmul.mubr.msk.f32.gmra.mrb[18].mxu0 %vm395_vm3, %v1031_v31  ;;  %v1045_v25 = vrot.slane %v2401_v12, 2  ;;  %v1049_v12 = vsel %vm981_vm5, %v1047_v53, %v1048_v54 }
  0x59   : > { %1905 = vmatprep.mubr.msk.f32.mxu0 %vm395_vm3, %v1034_v35 }
  0x5b   : > { %1851 = vmatmul.mubr.msk.f32.gmra.mrb[18].mxu1 %vm395_vm3, %v2317_v26  ;;  %v1046_v26 = vsel %vm981_vm5, %v1043_v19, %v1045_v25 }
  0x5c   : > { %1853 = vmatprep.mubr.msk.f32.mxu1 %vm395_vm3, %v2338_v42  ;;  %1906 = vmatmul.mubr.msk.f32.gmra.mrb[20].mxu0 %vm395_vm3, %v1036_v8  ;;  %v1050_v42 = vrot.slane %v2424_v36, 2  ;;  %v1054_v36 = vsel %vm981_vm5, %v1052_v55, %v1053_v44 }
  0x5d   : > { %1908 = vmatprep.mubr.msk.f32.mxu0 %vm395_vm3, %v1039_v40 }
  0x5f   : > { %1854 = vmatmul.mubr.msk.f32.gmra.mrb[20].mxu1 %vm395_vm3, %v2341_v43  ;;  %v1051_v43 = vsel %vm981_vm5, %v1048_v54, %v1050_v42 }
  0x60   : > { %1856 = vmatprep.mubr.msk.f32.mxu1 %vm395_vm3, %v2361_v28  ;;  %1909 = vmatmul.mubr.msk.f32.gmra.mrb[22].mxu0 %vm395_vm3, %v1041_v9  ;;  %v1055_v28 = vrot.slane %v2447_v52, 2 }
  0x61   : > { %1911 = vmatprep.mubr.msk.f32.mxu0 %vm395_vm3, %v1044_v3 }
  0x63   : > { %1857 = vmatmul.mubr.msk.f32.gmra.mrb[22].mxu1 %vm395_vm3, %v2364_v58  ;;  %v1056_v58 = vsel %vm981_vm5, %v1053_v44, %v1055_v28 }
  0x64   : > { %1859 = vmatprep.mubr.msk.f32.mxu1 %vm395_vm3, %v2384_v13  ;;  %1912 = vmatmul.mubr.msk.f32.gmra.mrb[24].mxu0 %vm395_vm3, %v1046_v26  ;;  %v1060_v13 = vrot.slane %v2470_v4, 2 }
  0x65   : > { %1914 = vmatprep.mubr.msk.f32.mxu0 %vm395_vm3, %v1049_v12 }
  0x67   : > { %1860 = vmatmul.mubr.msk.f32.gmra.mrb[24].mxu1 %vm395_vm3, %v2387_v10  ;;  %v1061_v10 = vsel %vm981_vm5, %v1058_v49, %v1060_v13 }
  0x68   : > { %1862 = vmatprep.mubr.msk.f32.mxu1 %vm395_vm3, %v2407_v45  ;;  %1915 = vmatmul.mubr.msk.f32.gmra.mrb[26].mxu0 %vm395_vm3, %v1051_v43 }
  0x69   : > { %1917 = vmatprep.mubr.msk.f32.mxu0 %vm395_vm3, %v1054_v36 }
  0x6b   : > { %1863 = vmatmul.mubr.msk.f32.gmra.mrb[26].mxu1 %vm395_vm3, %v2410_v27 }
  0x6c   : > { %1865 = vmatprep.mubr.msk.f32.mxu1 %vm395_vm3, %v2430_v23  ;;  %1918 = vmatmul.mubr.msk.f32.gmra.mrb[28].mxu0 %vm395_vm3, %v1056_v58 }
  0x6d   : > { %1920 = vmatprep.mubr.msk.f32.mxu0 %vm395_vm3, %v1059_v50 }
  0x6f   : > { %1866 = vmatmul.mubr.msk.f32.gmra.mrb[28].mxu1 %vm395_vm3, %v2433_v24 }
  0x70   : > { %1868 = vmatprep.mubr.msk.f32.mxu1 %vm395_vm3, %v2453_v61  ;;  %1921 = vmatmul.mubr.msk.f32.gmra.mrb[30].mxu0 %vm395_vm3, %v1061_v10 }
  0x73   : > { %1869 = vmatmul.mubr.msk.f32.gmra.mrb[30].mxu1 %vm395_vm3, %v2456_v29  ;;  %v2578_v29 = vld [vmem:[%s2660_s2] ss:$0 sm:$0xff] }
  0xea   : > { %v1773_v45 = vpop.f32.mrb[0].mxu1 }
  0xeb   : > { %v530_v27 = vpop.f32.mrb[1].mxu1 }
  0xee   : > { %v1776_v23 = vpop.f32.mrb[2].mxu1 }
  0xef   : > { %v540_v52 = vpop.f32.mrb[3].mxu1 }
  0xf2   : > { %v1779_v56 = vpop.f32.mrb[4].mxu1 }
  0xf3   : > { %v550_v57 = vpop.f32.mrb[5].mxu1 }
  0xf6   : > { %v1782_v59 = vpop.f32.mrb[6].mxu1 }
  0xf7   : > { %v560_v30 = vpop.f32.mrb[7].mxu1 }
  0xfa   : > { %v1785_v60 = vpop.f32.mrb[8].mxu1 }
  0xfb   : > { %v570_v62 = vpop.f32.mrb[9].mxu1 }
  0xfe   : > { %v1788_v24 = vpop.f32.mrb[10].mxu1 }
  0xff   : > { %v580_v63 = vpop.f32.mrb[11].mxu1 }
 0x102   : > { %v1791_v0 = vpop.f32.mrb[12].mxu1 }
 0x103   : > { %v590_v61 = vpop.f32.mrb[13].mxu1 }
 0x106   : > { %v1794_v1 = vpop.f32.mrb[14].mxu1 }
 0x107   : > { %v600_v2 = vpop.f32.mrb[15].mxu1  ;;  %v1877_v4 = vpop.f32.mrb[0].mxu0 }
 0x108   : > { %v1943_v6 = vadd.f32 %v1877_v4, %v1773_v45  ;;  %v1198_v7 = vpop.f32.mrb[1].mxu0 }
 0x109   : > { %v1944_v37 = vadd.f32 %v1198_v7, %v530_v27 }
 0x10a   : > { %v1397_v5 = vadd.f32 %v1943_v6, %v2578_v29 }
 0x10b   : > { %v1396_v38 = vadd.f32 %v1944_v37, %v2578_v29  ;;  %v1880_v39 = vpop.f32.mrb[2].mxu0 }
 0x10c   : > { %1429 = vst [vmem:[%s2583_s10 + $0x8] sm:$0xff] %v1397_v5  ;;  %v1945_v11 = vadd.f32 %v1880_v39, %v1776_v23  ;;  %v1208_v14 = vpop.f32.mrb[3].mxu0 }
 0x10d   : > { %1428 = vst [vmem:[%s2583_s10] sm:$0xff] %v1396_v38  ;;  %v1946_v17 = vadd.f32 %v1208_v14, %v540_v52 }
 0x10e   : > { %v1399_v18 = vadd.f32 %v1945_v11, %v2578_v29 }
 0x10f   : > { %v1398_v21 = vadd.f32 %v1946_v17, %v2578_v29  ;;  %v1883_v22 = vpop.f32.mrb[4].mxu0 }
 0x110   : > { %1431 = vst [vmem:[%s2583_s10 + $0x18] sm:$0xff] %v1399_v18  ;;  %v1947_v15 = vadd.f32 %v1883_v22, %v1779_v56  ;;  %v1218_v20 = vpop.f32.mrb[5].mxu0 }
 0x111   : > { %1430 = vst [vmem:[%s2583_s10 + $0x10] sm:$0xff] %v1398_v21  ;;  %v1948_v16 = vadd.f32 %v1218_v20, %v550_v57 }
 0x112   : > { %v1401_v46 = vadd.f32 %v1947_v15, %v2578_v29 }
 0x113   : > { %v1400_v47 = vadd.f32 %v1948_v16, %v2578_v29  ;;  %v1886_v31 = vpop.f32.mrb[6].mxu0 }
 0x114   : > { %1433 = vst [vmem:[%s2583_s10 + $0x28] sm:$0xff] %v1401_v46  ;;  %v1949_v32 = vadd.f32 %v1886_v31, %v1782_v59  ;;  %v1228_v35 = vpop.f32.mrb[7].mxu0 }
 0x115   : > { %1432 = vst [vmem:[%s2583_s10 + $0x20] sm:$0xff] %v1400_v47  ;;  %v1950_v33 = vadd.f32 %v1228_v35, %v560_v30 }
 0x116   : > { %v1403_v34 = vadd.f32 %v1949_v32, %v2578_v29 }
 0x117   : > { %v1402_v8 = vadd.f32 %v1950_v33, %v2578_v29  ;;  %v1889_v51 = vpop.f32.mrb[8].mxu0 }
 0x118   : > { %1435 = vst [vmem:[%s2583_s10 + $0x38] sm:$0xff] %v1403_v34  ;;  %v1951_v40 = vadd.f32 %v1889_v51, %v1785_v60  ;;  %v1238_v41 = vpop.f32.mrb[9].mxu0 }
 0x119   : > { %1434 = vst [vmem:[%s2583_s10 + $0x30] sm:$0xff] %v1402_v8  ;;  %v1952_v19 = vadd.f32 %v1238_v41, %v570_v62 }
 0x11a   : > { %v1405_v9 = vadd.f32 %v1951_v40, %v2578_v29 }
 0x11b   : > { %v1404_v25 = vadd.f32 %v1952_v19, %v2578_v29  ;;  %v1892_v3 = vpop.f32.mrb[10].mxu0 }
 0x11c   : > { %1437 = vst [vmem:[%s2583_s10 + $0x48] sm:$0xff] %v1405_v9  ;;  %v1953_v53 = vadd.f32 %v1892_v3, %v1788_v24  ;;  %v1248_v54 = vpop.f32.mrb[11].mxu0 }
 0x11d   : > { %1436 = vst [vmem:[%s2583_s10 + $0x40] sm:$0xff] %v1404_v25  ;;  %v1954_v26 = vadd.f32 %v1248_v54, %v580_v63 }
 0x11e   : > { %v1407_v42 = vadd.f32 %v1953_v53, %v2578_v29 }
 0x11f   : > { %v1406_v12 = vadd.f32 %v1954_v26, %v2578_v29  ;;  %v1895_v55 = vpop.f32.mrb[12].mxu0 }
 0x120   : > { %1439 = vst [vmem:[%s2583_s10 + $0x58] sm:$0xff] %v1407_v42  ;;  %v1955_v44 = vadd.f32 %v1895_v55, %v1791_v0  ;;  %v1258_v43 = vpop.f32.mrb[13].mxu0 }
 0x121   : > { %1438 = vst [vmem:[%s2583_s10 + $0x50] sm:$0xff] %v1406_v12  ;;  %v1956_v28 = vadd.f32 %v1258_v43, %v590_v61 }
 0x122   : > { %v1409_v36 = vadd.f32 %v1955_v44, %v2578_v29 }
 0x123   : > { %v1408_v48 = vadd.f32 %v1956_v28, %v2578_v29  ;;  %v1898_v49 = vpop.f32.mrb[14].mxu0 }
 0x124   : > { %1441 = vst [vmem:[%s2583_s10 + $0x68] sm:$0xff] %v1409_v36  ;;  %v1957_v58 = vadd.f32 %v1898_v49, %v1794_v1  ;;  %v1268_v13 = vpop.f32.mrb[15].mxu0 }
 0x125   : > { %1440 = vst [vmem:[%s2583_s10 + $0x60] sm:$0xff] %v1408_v48  ;;  %v1958_v50 = vadd.f32 %v1268_v13, %v600_v2 }
 0x126   : > { %v1411_v10 = vadd.f32 %v1957_v58, %v2578_v29 }
 0x127   : > { %v1410_v45 = vadd.f32 %v1958_v50, %v2578_v29  ;;  %v1901_v27 = vpop.f32.mrb[16].mxu0 }
 0x128   : > { %1443 = vst [vmem:[%s2583_s10 + $0x78] sm:$0xff] %v1411_v10  ;;  %v1278_v23 = vpop.f32.mrb[17].mxu0 }
 0x129   : > { %1442 = vst [vmem:[%s2583_s10 + $0x70] sm:$0xff] %v1410_v45 }
 0x12a   : > { %v1849_v52 = vpop.f32.mrb[16].mxu1 }
 0x12b   : > { %v1959_v56 = vadd.f32 %v1901_v27, %v1849_v52  ;;  %v902_v57 = vpop.f32.mrb[17].mxu1  ;;  %v1904_v59 = vpop.f32.mrb[18].mxu0 }
 0x12c   : > { %v1960_v30 = vadd.f32 %v1278_v23, %v902_v57  ;;  %v1288_v60 = vpop.f32.mrb[19].mxu0 }
 0x12d   : > { %v1413_v62 = vadd.f32 %v1959_v56, %v2578_v29 }
 0x12e   : > { %v1412_v24 = vadd.f32 %v1960_v30, %v2578_v29  ;;  %v1852_v63 = vpop.f32.mrb[18].mxu1 }
 0x12f   : > { %1445 = vst [vmem:[%s2583_s10 + $0x88] sm:$0xff] %v1413_v62  ;;  %v1961_v0 = vadd.f32 %v1904_v59, %v1852_v63  ;;  %v912_v61 = vpop.f32.mrb[19].mxu1  ;;  %v1907_v1 = vpop.f32.mrb[20].mxu0 }
 0x130   : > { %1444 = vst [vmem:[%s2583_s10 + $0x80] sm:$0xff] %v1412_v24  ;;  %v1962_v2 = vadd.f32 %v1288_v60, %v912_v61  ;;  %v1298_v4 = vpop.f32.mrb[21].mxu0 }
 0x131   : > { %v1415_v6 = vadd.f32 %v1961_v0, %v2578_v29 }
 0x132   : > { %v1414_v7 = vadd.f32 %v1962_v2, %v2578_v29  ;;  %v1855_v37 = vpop.f32.mrb[20].mxu1 }
 0x133   : > { %1447 = vst [vmem:[%s2583_s10 + $0x98] sm:$0xff] %v1415_v6  ;;  %v1963_v5 = vadd.f32 %v1907_v1, %v1855_v37  ;;  %v922_v38 = vpop.f32.mrb[21].mxu1  ;;  %v1910_v39 = vpop.f32.mrb[22].mxu0 }
 0x134   : > { %1446 = vst [vmem:[%s2583_s10 + $0x90] sm:$0xff] %v1414_v7  ;;  %v1964_v11 = vadd.f32 %v1298_v4, %v922_v38  ;;  %v1308_v14 = vpop.f32.mrb[23].mxu0 }
 0x135   : > { %v1417_v17 = vadd.f32 %v1963_v5, %v2578_v29 }
 0x136   : > { %v1416_v18 = vadd.f32 %v1964_v11, %v2578_v29  ;;  %v1858_v21 = vpop.f32.mrb[22].mxu1 }
 0x137   : > { %1449 = vst [vmem:[%s2583_s10 + $0xa8] sm:$0xff] %v1417_v17  ;;  %v1965_v22 = vadd.f32 %v1910_v39, %v1858_v21  ;;  %v932_v15 = vpop.f32.mrb[23].mxu1  ;;  %v1913_v20 = vpop.f32.mrb[24].mxu0 }
 0x138   : > { %1448 = vst [vmem:[%s2583_s10 + $0xa0] sm:$0xff] %v1416_v18  ;;  %v1966_v16 = vadd.f32 %v1308_v14, %v932_v15  ;;  %v1318_v46 = vpop.f32.mrb[25].mxu0 }
 0x139   : > { %v1419_v47 = vadd.f32 %v1965_v22, %v2578_v29 }
 0x13a   : > { %v1418_v31 = vadd.f32 %v1966_v16, %v2578_v29  ;;  %v1861_v32 = vpop.f32.mrb[24].mxu1 }
 0x13b   : > { %1451 = vst [vmem:[%s2583_s10 + $0xb8] sm:$0xff] %v1419_v47  ;;  %v1967_v35 = vadd.f32 %v1913_v20, %v1861_v32  ;;  %v942_v33 = vpop.f32.mrb[25].mxu1  ;;  %v1916_v34 = vpop.f32.mrb[26].mxu0 }
 0x13c   : > { %1450 = vst [vmem:[%s2583_s10 + $0xb0] sm:$0xff] %v1418_v31  ;;  %v1968_v8 = vadd.f32 %v1318_v46, %v942_v33  ;;  %v1328_v51 = vpop.f32.mrb[27].mxu0 }
 0x13d   : > { %v1421_v40 = vadd.f32 %v1967_v35, %v2578_v29 }
 0x13e   : > { %v1420_v41 = vadd.f32 %v1968_v8, %v2578_v29  ;;  %v1864_v19 = vpop.f32.mrb[26].mxu1 }
 0x13f   : > { %1453 = vst [vmem:[%s2583_s10 + $0xc8] sm:$0xff] %v1421_v40  ;;  %v1969_v9 = vadd.f32 %v1916_v34, %v1864_v19  ;;  %v952_v25 = vpop.f32.mrb[27].mxu1  ;;  %v1919_v3 = vpop.f32.mrb[28].mxu0 }
 0x140   : > { %1452 = vst [vmem:[%s2583_s10 + $0xc0] sm:$0xff] %v1420_v41  ;;  %v1970_v53 = vadd.f32 %v1328_v51, %v952_v25  ;;  %v1338_v54 = vpop.f32.mrb[29].mxu0 }
 0x141   : > { %v1423_v26 = vadd.f32 %v1969_v9, %v2578_v29 }
 0x142   : > { %v1422_v42 = vadd.f32 %v1970_v53, %v2578_v29  ;;  %v1867_v12 = vpop.f32.mrb[28].mxu1 }
 0x143   : > { %1455 = vst [vmem:[%s2583_s10 + $0xd8] sm:$0xff] %v1423_v26  ;;  %v1971_v55 = vadd.f32 %v1919_v3, %v1867_v12  ;;  %v962_v44 = vpop.f32.mrb[29].mxu1  ;;  %v1922_v43 = vpop.f32.mrb[30].mxu0 }
 0x144   : > { %1454 = vst [vmem:[%s2583_s10 + $0xd0] sm:$0xff] %v1422_v42  ;;  %v1972_v28 = vadd.f32 %v1338_v54, %v962_v44  ;;  %v1348_v36 = vpop.f32.mrb[31].mxu0 }
 0x145   : > { %v1425_v48 = vadd.f32 %v1971_v55, %v2578_v29 }
 0x146   : > { %v1424_v49 = vadd.f32 %v1972_v28, %v2578_v29  ;;  %v1870_v58 = vpop.f32.mrb[30].mxu1 }
 0x147   : > { %1457 = vst [vmem:[%s2583_s10 + $0xe8] sm:$0xff] %v1425_v48  ;;  %v1973_v13 = vadd.f32 %v1922_v43, %v1870_v58  ;;  %v972_v50 = vpop.f32.mrb[31].mxu1 }
 0x148   : > { %1456 = vst [vmem:[%s2583_s10 + $0xe0] sm:$0xff] %v1424_v49  ;;  %v1974_v10 = vadd.f32 %v1348_v36, %v972_v50 }
 0x149   : > { %v1427_v45 = vadd.f32 %v1973_v13, %v2578_v29 }
 0x14a   : > { %v1426_v27 = vadd.f32 %v1974_v10, %v2578_v29 }
 0x14b   : > { %1459 = vst [vmem:[%s2583_s10 + $0xf8] sm:$0xff] %v1427_v45 }
 0x14c   : > { %1458 = vst [vmem:[%s2583_s10 + $0xf0] sm:$0xff] %v1426_v27 }
 0x14d PF: > { %s13_s14 = sadd.s32 1, %s2055_s14   ;;  %s2664_s12 = smov %s2051_s13 }
 0x14e   : > { %p10_p5 = scmp.ge.s32.totalorder %s13_s14, 4   ;;  %s2665_s13 = smov %s2667_s15 }
 0x150   :  { %12 = sbr.rel (!%p10_p5) target bundleno = 2 (0x2), region = 64 }

</bundles_post_ra>
